<compile_context>
chip_gen: v5e
topology: v5e:2x2
jax: 0.10.0
libtpu: 0.0.40
codegen_flags: <defaults>
</compile_context>

<pallas_src>
import functools

import jax
import jax.numpy as jnp
from jax.experimental import pallas as pl
from jax.experimental.pallas import tpu as pltpu


def _round_up(x, m):
    return ((x + m - 1) // m) * m


def _vmem_budget_bytes():
    # ~70% of per-core VMEM (v7x: 64 MiB/TC, v5e/v6e: 128 MiB); leaves
    # headroom for compiler-internal scratch.
    try:
        cap = int(getattr(pltpu.get_tpu_info(), "vmem_capacity_bytes", 64 << 20))
    except Exception:
        cap = 64 << 20
    return int(0.70 * cap)


def _tgcn_matmul_kernel(x_ref, w_ref, b_ref, o_ref):
    # o(tm, tn) = x(tm, KKp) @ Wbig(KKp, tn) + bias(1, tn); f32 accumulation.
    acc = jnp.dot(x_ref[...], w_ref[...], preferred_element_type=jnp.float32)
    o_ref[...] = (acc + b_ref[...]).astype(o_ref.dtype)


def conv_temporal_graphical(x, A, weight, bias, kernel_size, *,
                            tm_max=512, tn_max=512, matmul_dtype=None):
    """x:(N,Cin,T,V), A:(K,V,V), weight:(K*Cout,Cin,1,1), bias:(K*Cout,)|None."""
    assert A.shape[0] == kernel_size, f"{A.shape[0]}, {kernel_size}"
    N, Cin, T, V = x.shape
    K = kernel_size
    KC, w_cin, kt, kv = weight.shape
    # TODO(synk): temporal_kernel_size > 1 not implemented (1x1 conv path only).
    assert (kt, kv) == (1, 1), "only temporal_kernel_size=1 is supported"
    assert w_cin == Cin and KC % K == 0
    Cout = KC // K

    M = N * T          # folded (batch, time) rows
    KK = Cin * V       # fused contraction dim, column order (ci, v)
    NN = V * Cout      # fused output-column dim (lane axis), order (w, c)

    mm_dtype = x.dtype if matmul_dtype is None else jnp.dtype(matmul_dtype)

    # ---- wrapper-side weight / bias fusion (tiny precompute) ----------------
    a_f = A.astype(jnp.float32)
    w_r = weight.reshape(K, Cout, Cin).astype(jnp.float32)
    # Wbig[ci, v, w, c] = sum_k A[k,v,w] * W[k,c,ci]   (rows match x's (ci,v))
    w_big = jnp.einsum('kvw,kci->ivwc', a_f, w_r).reshape(KK, NN)
    if bias is None:
        b_eff = jnp.zeros((1, NN), jnp.float32)
    else:
        b_r = bias.reshape(K, Cout).astype(jnp.float32)
        b_eff = jnp.einsum('kvw,kc->wc', a_f, b_r).reshape(1, NN)
    w_big = w_big.astype(mm_dtype)

    # ---- tiling --------------------------------------------------------------
    isz = jnp.dtype(mm_dtype).itemsize
    osz = jnp.dtype(x.dtype).itemsize
    sub = {4: 8, 2: 16, 1: 32}.get(isz, 8)        # sublane multiple per dtype

    KK_pad = _round_up(KK, 128)                   # unmasked x loads / MXU feed
    NN_128 = _round_up(NN, 128)

    tm = min(tm_max, _round_up(M, sub))
    if tm >= M and M > sub:
        # Keep >= 2 row tiles so megacore (v7x, 2 TCs) can shard the M axis.
        tm = _round_up((M + 1) // 2, sub)

    budget = _vmem_budget_bytes()

    def _resident_bytes(tm_):
        return 2 * (tm_ * KK_pad * isz + KK_pad * NN_128 * isz
                    + NN_128 * 4 + tm_ * NN_128 * osz)

    resident = _resident_bytes(tm) <= budget

    if resident:
        # Wbig / bias fully VMEM-resident; 1-D grid over row tiles only.
        tn = N_pad = NN_128
        M_pad = _round_up(M, tm)
        grid = (M_pad // tm,)
        in_specs = [
            pl.BlockSpec((tm, KK_pad), lambda i: (i, 0)),
            pl.BlockSpec((KK_pad, N_pad), lambda i: (0, 0)),   # constant -> 1 DMA
            pl.BlockSpec((1, N_pad), lambda i: (0, 0)),
        ]
        out_specs = pl.BlockSpec((tm, N_pad), lambda i: (i, 0))
        dims = ("parallel",)
        need = _resident_bytes(tm)
    else:
        # Column tiles outermost, row tiles innermost: each Wbig column tile is
        # fetched once and stays resident across all row tiles.
        tn = min(tn_max, NN_128)

        def _tiled_bytes(tm_, tn_):
            return 2 * (tm_ * KK_pad * isz + KK_pad * tn_ * isz
                        + tn_ * 4 + tm_ * tn_ * osz)

        while _tiled_bytes(tm, tn) > budget:
            if tn > 128:
                tn = max(128, (tn // 2) // 128 * 128)
            elif tm > sub:
                tm = max(sub, _round_up(tm // 2, sub))
            else:
                break
        M_pad = _round_up(M, tm)
        N_pad = _round_up(NN, tn)
        grid = (N_pad // tn, M_pad // tm)
        in_specs = [
            pl.BlockSpec((tm, KK_pad), lambda j, i: (i, 0)),
            pl.BlockSpec((KK_pad, tn), lambda j, i: (0, j)),
            pl.BlockSpec((1, tn), lambda j, i: (0, j)),
        ]
        out_specs = pl.BlockSpec((tm, tn), lambda j, i: (i, j))
        dims = ("parallel", "parallel")
        need = _tiled_bytes(tm, tn)

    vmem_limit = int(min(max(need + (4 << 20), 32 << 20), budget))
    vmem_limit = max(vmem_limit, int(need))

    # ---- layout glue + padding (V kept contiguous; cheap relayout) ----------
    x_flat = jnp.transpose(x, (0, 2, 1, 3)).reshape(M, KK)   # rows (n,t), cols (ci,v)
    if x_flat.dtype != mm_dtype:
        x_flat = x_flat.astype(mm_dtype)
    x_flat = jnp.pad(x_flat, ((0, M_pad - M), (0, KK_pad - KK)))
    w_big = jnp.pad(w_big, ((0, KK_pad - KK), (0, N_pad - NN)))
    b_eff = jnp.pad(b_eff, ((0, 0), (0, N_pad - NN)))

    cost = pl.CostEstimate(
        flops=2 * M * KK * NN,
        transcendentals=0,
        bytes_accessed=(M_pad * KK_pad * isz + KK_pad * N_pad * isz
                        + N_pad * 4 + M_pad * N_pad * osz),
    )

    out = pl.pallas_call(
        _tgcn_matmul_kernel,
        out_shape=jax.ShapeDtypeStruct((M_pad, N_pad), x.dtype),
        grid_spec=pltpu.PrefetchScalarGridSpec(
            num_scalar_prefetch=0,
            grid=grid,
            in_specs=in_specs,
            out_specs=out_specs,
        ),
        compiler_params=pltpu.CompilerParams(
            dimension_semantics=dims,
            vmem_limit_bytes=vmem_limit),
        cost_estimate=cost,
    )(x_flat, w_big, b_eff)

    # Unpad and return in the PyTorch layout 'nctw' == (N, Cout, T, V).
    out = out[:M, :NN].reshape(N, T, V, Cout).transpose(0, 3, 1, 2)
    return out, A


def _reference(x, A, weight, bias, K):
    # Pure-JAX reference mirroring the PyTorch forward.
    Cin = x.shape[1]
    W = weight.reshape(-1, Cin)                                # (K*Cout, Cin)
    y = jnp.einsum('nctv,oc->notv', x, W)
    if bias is not None:
        y = y + bias[None, :, None, None]
    n, kc, T, V = y.shape
    y = y.reshape(n, K, kc // K, T, V)
    return jnp.einsum('nkctv,kvw->nctw', y, A)


def _run_case(key, N, Cin, Cout, K, T, V):
    kx, ka, kw, kb = jax.random.split(key, 4)
    x = jax.random.normal(kx, (N, Cin, T, V), dtype=jnp.float32)
    A = jax.random.normal(ka, (K, V, V), dtype=jnp.float32)
    weight = 0.1 * jax.random.normal(kw, (K * Cout, Cin, 1, 1), dtype=jnp.float32)
    bias = 0.1 * jax.random.normal(kb, (K * Cout,), dtype=jnp.float32)

    fwd = jax.jit(functools.partial(conv_temporal_graphical, kernel_size=K))
    out, A_out = fwd(x, A, weight, bias)
    out = jax.block_until_ready(out)

    ref = _reference(x, A, weight, bias, K)
    assert out.shape == (N, Cout, T, V)
    assert jnp.allclose(out, ref, rtol=1e-4, atol=1e-4), "mismatch vs reference"
    assert A_out.shape == A.shape


if __name__ == "__main__":
    key = jax.random.PRNGKey(0)
    k1, k2 = jax.random.split(key)
    # Typical small case: KK/NN already 128-aligned; resident-W fast path.
    _run_case(k1, N=2, Cin=4, Cout=16, K=3, T=8, V=16)
    # Ragged case (V=25): exercises KK/NN zero-padding to 128 multiples.
    _run_case(k2, N=2, Cin=4, Cout=8, K=3, T=6, V=25)
    print("KERNEL_OK")
</pallas_src>

<mosaic_0001>
module attributes {stable_mosaic.version = 11 : i64} {
  func.func @_tgcn_matmul_kernel(%arg0: i32, %arg1: memref<8x128xf32, #tpu.memory_space<vmem>>, %arg2: memref<128x256xf32, #tpu.memory_space<vmem>>, %arg3: memref<1x256xf32, #tpu.memory_space<vmem>>, %arg4: memref<8x256xf32, #tpu.memory_space<vmem>>) attributes {dimension_semantics = [#tpu.dimension_semantics<parallel>], iteration_bounds = array<i64: 2>, scalar_prefetch = 0 : i64, scratch_operands = 0 : i64, tpu.core_type = #tpu.core_type<tc>, window_params = [{transform_indices = @transform_0, window_bounds = array<i64: 8, 128>}, {pipeline_mode = #tpu.pipeline_mode<synchronous>, transform_indices = @transform_1, window_bounds = array<i64: 128, 256>}, {pipeline_mode = #tpu.pipeline_mode<synchronous>, transform_indices = @transform_2, window_bounds = array<i64: 1, 256>}, {transform_indices = @transform_3, window_bounds = array<i64: 8, 256>}]} {
    %c0 = arith.constant 0 : index
    %c0_0 = arith.constant 0 : index
    %0 = vector.load %arg1[%c0, %c0_0] : memref<8x128xf32, #tpu.memory_space<vmem>>, vector<8x128xf32>
    %c0_1 = arith.constant 0 : index
    %c0_2 = arith.constant 0 : index
    %1 = vector.load %arg2[%c0_1, %c0_2] : memref<128x256xf32, #tpu.memory_space<vmem>>, vector<128x256xf32>
    %cst = arith.constant dense<0.000000e+00> : vector<8x256xf32>
    %2 = tpu.matmul %0, %1, %cst {dimension_numbers = #tpu.dot_dimension_numbers<[1], [0], [0], [1], [0, 0, 1, 1], [], []>} : vector<8x128xf32>, vector<128x256xf32>, vector<8x256xf32> -> vector<8x256xf32>
    %c0_3 = arith.constant 0 : index
    %c0_4 = arith.constant 0 : index
    %3 = vector.load %arg3[%c0_3, %c0_4] : memref<1x256xf32, #tpu.memory_space<vmem>>, vector<1x256xf32>
    %4 = vector.broadcast %3 : vector<1x256xf32> to vector<8x256xf32>
    %5 = arith.addf %2, %4 : vector<8x256xf32>
    %c0_5 = arith.constant 0 : index
    %c0_6 = arith.constant 0 : index
    %6 = vector.load %arg4[%c0_5, %c0_6] : memref<8x256xf32, #tpu.memory_space<vmem>>, vector<8x256xf32>
    tpu.vector_store %arg4[%c0_5, %c0_6], %5 {strides = array<i32>} : memref<8x256xf32, #tpu.memory_space<vmem>>, vector<8x256xf32>,
    return
  }
  func.func @transform_0(%arg0: i32) -> (i32, i32) {
    %c0_i32 = arith.constant 0 : i32
    %c0_i32_0 = arith.constant 0 : i32
    return %arg0, %c0_i32 : i32, i32
  }
  func.func @transform_1(%arg0: i32) -> (i32, i32) {
    %c0_i32 = arith.constant 0 : i32
    %c0_i32_0 = arith.constant 0 : i32
    %c0_i32_1 = arith.constant 0 : i32
    return %c0_i32, %c0_i32_0 : i32, i32
  }
  func.func @transform_2(%arg0: i32) -> (i32, i32) {
    %c0_i32 = arith.constant 0 : i32
    %c0_i32_0 = arith.constant 0 : i32
    %c0_i32_1 = arith.constant 0 : i32
    return %c0_i32, %c0_i32_0 : i32, i32
  }
  func.func @transform_3(%arg0: i32) -> (i32, i32) {
    %c0_i32 = arith.constant 0 : i32
    %c0_i32_0 = arith.constant 0 : i32
    return %arg0, %c0_i32 : i32, i32
  }
}

</mosaic_0001>

<bundles_post_ra>
// kernel: conv_temporal_graphical.1
= control target key start
LH: loop header
LB: loop body
LE: loop exit
PB: predicated region body
PF: predicated region fallthrough
CT: control target
= control target key end

     0   :  { %s351_s12 = smov 0   ;;  %s475_s0 = inlined_call_operand.vmem [shape: f32[16,128], index: 0, kind: input, shape index: {}]   ;;  %s476_s1 = inlined_call_operand.vmem [shape: f32[128,256], index: 1, kind: input, shape index: {}]   ;;  %s477_s2 = inlined_call_operand.vmem [shape: f32[1,256], index: 2, kind: input, shape index: {}]   ;;  %s478_s3 = inlined_call_operand.vmem [shape: f32[16,256], index: 3, kind: output, shape index: {}]  }
   0x1 LB: > { %s304_s13 = sadd.s32 4294967295, %s329_s12   ;;  %p308_p0 = scmp.ge.s32.totalorder %s329_s12, 1  ;;  %s329_s12 = sphi %s351_s12, %s13_s12  }
   0x2   : > { %p136_p1 = scmp.lt.s32.totalorder %s329_s12, 3 }
   0x4   : > { %p137_p2 = pnand %p308_p0, %p136_p1 }
   0x5   : > { %p159_p3 = scmp.lt.s32.totalorder (!%p137_p2), %s304_s13, 1 }
   0x6   : > { %140 = sbr.rel (%p137_p2) target bundleno = 173 (0xad), region = 32 }
   0xb   : > { %v199_v0 = vld [vmem:[%s476_s1 + $0xf0] sm:$0xff]  ;;  %v200_v1 = vld [vmem:[%s476_s1 + $0xf8] sm:$0xff]  ;;  %v197_v2 = vld [vmem:[%s476_s1 + $0xe0] sm:$0xff]  ;;  %s480_s13 = smov (!%p159_p3, %s304_s13), 1 }
   0xc   : > { %207 = vmatpush.msra.mxu0 %v199_v0  ;;  %227 = vmatpush.msra.mxu1 %v200_v1  ;;  %v198_v3 = vld [vmem:[%s476_s1 + $0xe8] sm:$0xff]  ;;  %v195_v4 = vld [vmem:[%s476_s1 + $0xd0] sm:$0xff]  ;;  %v196_v5 = vld [vmem:[%s476_s1 + $0xd8] sm:$0xff]  ;;  %s309_s16 = sshll.u32 %s480_s13, 3  ;;  %s314_s7 = sshll.u32 %s480_s13, 4 }
   0xd   : > { %v193_v6 = vld [vmem:[%s476_s1 + $0xc0] sm:$0xff]  ;;  %v194_v7 = vld [vmem:[%s476_s1 + $0xc8] sm:$0xff]  ;;  %v191_v8 = vld [vmem:[%s476_s1 + $0xb0] sm:$0xff]  ;;  %s162_s27 = scalar_lea.vmem %s475_s0, %s309_s16  ;;  %s167_s10 = scalar_lea.vmem %s478_s3, %s314_s7 }
   0xe   : > { %208 = vmatpush.msra.mxu0 %v197_v2  ;;  %228 = vmatpush.msra.mxu1 %v198_v3  ;;  %v192_v9 = vld [vmem:[%s476_s1 + $0xb8] sm:$0xff]  ;;  %v189_v10 = vld [vmem:[%s476_s1 + $0xa0] sm:$0xff]  ;;  %v190_v11 = vld [vmem:[%s476_s1 + $0xa8] sm:$0xff] }
   0xf   : > { %v187_v12 = vld [vmem:[%s476_s1 + $0x90] sm:$0xff]  ;;  %v188_v13 = vld [vmem:[%s476_s1 + $0x98] sm:$0xff]  ;;  %v185_v14 = vld [vmem:[%s476_s1 + $0x80] sm:$0xff] }
  0x10   : > { %209 = vmatpush.msra.mxu0 %v195_v4  ;;  %229 = vmatpush.msra.mxu1 %v196_v5  ;;  %v186_v15 = vld [vmem:[%s476_s1 + $0x88] sm:$0xff]  ;;  %v183_v16 = vld [vmem:[%s476_s1 + $0x70] sm:$0xff]  ;;  %v184_v17 = vld [vmem:[%s476_s1 + $0x78] sm:$0xff] }
  0x11   : > { %v181_v18 = vld [vmem:[%s476_s1 + $0x60] sm:$0xff]  ;;  %v182_v19 = vld [vmem:[%s476_s1 + $0x68] sm:$0xff]  ;;  %v179_v20 = vld [vmem:[%s476_s1 + $0x50] sm:$0xff] }
  0x12   : > { %210 = vmatpush.msra.mxu0 %v193_v6  ;;  %230 = vmatpush.msra.mxu1 %v194_v7  ;;  %v180_v21 = vld [vmem:[%s476_s1 + $0x58] sm:$0xff]  ;;  %v177_v22 = vld [vmem:[%s476_s1 + $0x40] sm:$0xff]  ;;  %v178_v23 = vld [vmem:[%s476_s1 + $0x48] sm:$0xff] }
  0x13   : > { %v175_v24 = vld [vmem:[%s476_s1 + $0x30] sm:$0xff]  ;;  %v176_v25 = vld [vmem:[%s476_s1 + $0x38] sm:$0xff]  ;;  %v173_v26 = vld [vmem:[%s476_s1 + $0x20] sm:$0xff] }
  0x14   : > { %211 = vmatpush.msra.mxu0 %v191_v8  ;;  %231 = vmatpush.msra.mxu1 %v192_v9  ;;  %v174_v27 = vld [vmem:[%s476_s1 + $0x28] sm:$0xff]  ;;  %v171_v28 = vld [vmem:[%s476_s1 + $0x10] sm:$0xff]  ;;  %v172_v29 = vld [vmem:[%s476_s1 + $0x18] sm:$0xff] }
  0x15   : > { %v169_v30 = vld [vmem:[%s476_s1] sm:$0xff]  ;;  %v170_v31 = vld [vmem:[%s476_s1 + $0x8] sm:$0xff] }
  0x16   : > { %212 = vmatpush.msra.mxu0 %v189_v10  ;;  %232 = vmatpush.msra.mxu1 %v190_v11  ;;  %v168_v32 = vld [vmem:[%s162_s27] sm:$0xff] }
  0x17   : > { %v201_v33 = vld [vmem:[%s477_s2] sm:$0x3] }
  0x18   : > { %213 = vmatpush.msra.mxu0 %v187_v12  ;;  %233 = vmatpush.msra.mxu1 %v188_v13  ;;  %v203_v34 = vperm.slane %v201_v33, 0  ;;  %v204_v35 = vperm.slane %v201_v33, 1 }
  0x1a   : > { %214 = vmatpush.msra.mxu0 %v185_v14  ;;  %234 = vmatpush.msra.mxu1 %v186_v15 }
  0x1c   : > { %215 = vmatpush.msra.mxu0 %v183_v16  ;;  %235 = vmatpush.msra.mxu1 %v184_v17 }
  0x1e   : > { %216 = vmatpush.msra.mxu0 %v181_v18  ;;  %236 = vmatpush.msra.mxu1 %v182_v19 }
  0x20   : > { %217 = vmatpush.msra.mxu0 %v179_v20  ;;  %237 = vmatpush.msra.mxu1 %v180_v21 }
  0x22   : > { %218 = vmatpush.msra.mxu0 %v177_v22  ;;  %238 = vmatpush.msra.mxu1 %v178_v23 }
  0x24   : > { %219 = vmatpush.msra.mxu0 %v175_v24  ;;  %239 = vmatpush.msra.mxu1 %v176_v25 }
  0x26   : > { %220 = vmatpush.msra.mxu0 %v173_v26  ;;  %240 = vmatpush.msra.mxu1 %v174_v27 }
  0x28   : > { %221 = vmatpush.msra.mxu0 %v171_v28  ;;  %241 = vmatpush.msra.mxu1 %v172_v29 }
  0x2a   : > { %222 = vmatpush.msra.mxu0 %v169_v30  ;;  %242 = vmatpush.msra.mxu1 %v170_v31 }
  0x2b   : > { %223 = vmatmul.f32.vlgmr.msra.gmra.mxu0 %v168_v32  ;;  %243 = vmatmul.f32.vlgmr.msra.gmra.mxu1 %v168_v32 }
  0xa8   : > { %v224_v36 = vpop.f32.mrf.mxu0  ;;  %v244_v37 = vpop.f32.mrf.mxu1 }
  0xa9   : > { %v225_v38 = vadd.f32 %v224_v36, %v203_v34  ;;  %v245_v39 = vadd.f32 %v244_v37, %v204_v35 }
  0xab   : > { %247 = vst [vmem:[%s167_s10] sm:$0xff] %v225_v38 }
  0xac   : > { %248 = vst [vmem:[%s167_s10 + $0x8] sm:$0xff] %v245_v39 }
  0xad PF: > { %s13_s12 = sadd.s32 1, %s329_s12  }
  0xae   : > { %p10_p4 = scmp.ge.s32.totalorder %s13_s12, 4  }
  0xb0   :  { %12 = sbr.rel (!%p10_p4) target bundleno = 1 (0x1), region = 62 }

</bundles_post_ra>
